<compile_context>
chip_gen: v7x
topology: tpu7x:2x2x1
jax: 0.10.0
libtpu: 0.0.40
codegen_flags: <defaults>
</compile_context>

<pallas_src>
import functools

import jax
import jax.numpy as jnp
from jax.experimental import pallas as pl
from jax.experimental.pallas import tpu as pltpu

_LANE = 128          # batch is the lane dim of every tile -> keep it a multiple of 128
_BM_CAP = 2048       # max batch-tile; amortizes per-grid-step overhead, fits VMEM easily


def _round_up(x, m):
    return ((x + m - 1) // m) * m


def mlp_kernel(xt_ref, w1_ref, b1_ref, w2_ref, b2_ref, o_ref):
    """One batch tile, fully transposed: features on sublanes, batch on lanes."""
    # layer1: (H, num_input) @ (num_input, bm) -> (H, bm), f32 accumulation on the MXU.
    z1 = jnp.dot(w1_ref[...], xt_ref[...], preferred_element_type=jnp.float32)
    z1 = z1 + b1_ref[...]                       # (H, 1) broadcasts along lanes (f32)
    a1 = jnp.tanh(z1)                           # f32 on VPU/EUP (v5e-safe)
    # layer3: (num_output, H) @ (H, bm) -> (num_output, bm); cast a1 to MXU dtype.
    z2 = jnp.dot(w2_ref[...], a1.astype(w2_ref.dtype),
                 preferred_element_type=jnp.float32)
    z2 = z2 + b2_ref[...]                       # (num_output, 1) broadcast
    o_ref[...] = z2.astype(o_ref.dtype)         # lane-dense store, no padded columns


def prepare_params(w1, b1, w2, b2, compute_dtype=jnp.bfloat16):
    """One-time parameter layout.

    w1: (num_hidden, num_input), b1: (num_hidden,)   -- PyTorch nn.Linear convention
    w2: (num_output, num_hidden), b2: (num_output,)

    Because the kernel computes W @ x^T, the weights keep their native
    (out_features, in_features) layout (no transpose, no feature padding).
    Biases become column vectors so they broadcast along the lane (batch) dim.
    """
    w1c = jnp.asarray(w1, compute_dtype)                 # (H, num_input)
    w2c = jnp.asarray(w2, compute_dtype)                 # (num_output, H)
    b1c = jnp.asarray(b1, jnp.float32).reshape(-1, 1)    # (H, 1)
    b2c = jnp.asarray(b2, jnp.float32).reshape(-1, 1)    # (num_output, 1)
    return w1c, b1c, w2c, b2c


@functools.partial(jax.jit, static_argnames=("compute_dtype",))
def module_model_forward(x, w1c, b1c, w2c, b2c, *, compute_dtype=jnp.bfloat16):
    """Forward pass matching the PyTorch module: returns (B, num_output) float32."""
    B, num_input = x.shape
    H = w1c.shape[0]
    num_output = w2c.shape[0]

    # ---- batch tiling: batch is the lane dim; >=2 grid steps when B > 128 so the
    #      "parallel" grid axis can be sharded across v7x's two TensorCores. ----
    b128 = _round_up(B, _LANE)
    if b128 <= _LANE:
        bm = b128
    else:
        bm = min(_BM_CAP, _round_up(pl.cdiv(b128, 2), _LANE))
    b_pad = _round_up(B, bm)
    grid = (b_pad // bm,)

    # Transposed, batch-padded input (num_input, b_pad) in the MXU compute dtype.
    # (x traffic is tiny at these widths; this single fused XLA op replaces the old
    #  feature-dim zero-padding which blew up output writeback by ~128x.)
    xt = jnp.zeros((num_input, b_pad), compute_dtype).at[:, :B].set(
        jnp.asarray(x, compute_dtype).T)

    # ---- explicit VMEM budget: resident params + double-buffered x/out tiles +
    #      f32 intermediate working set, with headroom; clamped to v7x's 64 MiB. ----
    in_bytes = jnp.finfo(compute_dtype).bits // 8
    resident = (H * num_input + num_output * H) * in_bytes + (H + num_output) * 4
    per_step = 2 * (num_input * bm * in_bytes + num_output * bm * 4)
    interm = 2 * H * bm * 4
    vmem_limit = int(min(max(2 * resident + per_step + interm + (8 << 20),
                             16 << 20), 64 << 20))

    out = pl.pallas_call(
        mlp_kernel,
        out_shape=jax.ShapeDtypeStruct((num_output, b_pad), jnp.float32),
        grid_spec=pltpu.PrefetchScalarGridSpec(
            num_scalar_prefetch=0,
            grid=grid,
            in_specs=[
                pl.BlockSpec((num_input, bm), lambda i: (0, i)),   # x^T: tiled over batch lanes
                pl.BlockSpec((H, num_input), lambda i: (0, 0)),    # W1: resident
                pl.BlockSpec((H, 1), lambda i: (0, 0)),            # b1: resident
                pl.BlockSpec((num_output, H), lambda i: (0, 0)),   # W2: resident
                pl.BlockSpec((num_output, 1), lambda i: (0, 0)),   # b2: resident
            ],
            out_specs=pl.BlockSpec((num_output, bm), lambda i: (0, i)),
        ),
        compiler_params=pltpu.CompilerParams(
            dimension_semantics=("parallel",),
            vmem_limit_bytes=vmem_limit),
    )(xt, w1c, b1c, w2c, b2c)

    # Strip batch padding and return in the PyTorch layout (B, num_output).
    return out[:, :B].T


def _reference(x, w1, b1, w2, b2):
    a1 = jnp.tanh(x @ w1.T + b1)
    return a1 @ w2.T + b2


if __name__ == "__main__":
    # Shapes implied by the tutorial's shallow net (2-D points -> hidden -> 1 logit).
    batch, num_input, num_hidden, num_output = 8, 2, 32, 1

    key = jax.random.PRNGKey(0)
    kx, kw1, kb1, kw2, kb2 = jax.random.split(key, 5)

    x = jax.random.normal(kx, (batch, num_input), dtype=jnp.float32)
    # Deterministic parameter init (synthetic; mimics nn.Linear uniform init scale).
    w1 = jax.random.uniform(kw1, (num_hidden, num_input), jnp.float32, -0.5, 0.5)
    b1 = jax.random.uniform(kb1, (num_hidden,), jnp.float32, -0.5, 0.5)
    w2 = jax.random.uniform(kw2, (num_output, num_hidden), jnp.float32, -0.5, 0.5)
    b2 = jax.random.uniform(kb2, (num_output,), jnp.float32, -0.5, 0.5)

    ref = _reference(x, w1, b1, w2, b2)

    # 1) f32 MXU path: bit-accurate correctness check.
    p32 = prepare_params(w1, b1, w2, b2, compute_dtype=jnp.float32)
    out32 = jax.block_until_ready(
        module_model_forward(x, *p32, compute_dtype=jnp.float32))
    assert out32.shape == (batch, num_output)
    assert jnp.allclose(out32, ref, atol=1e-5, rtol=1e-5)

    # 2) bf16-operand MXU path (default / production): f32 accumulation + f32 tanh,
    #    tolerance relaxed for the bf16 operand rounding.
    pbf = prepare_params(w1, b1, w2, b2)
    outbf = jax.block_until_ready(module_model_forward(x, *pbf))
    assert outbf.shape == (batch, num_output)
    assert jnp.allclose(outbf, ref, atol=5e-2, rtol=5e-2)

    print("KERNEL_OK")
</pallas_src>

<mosaic_0001>
module attributes {stable_mosaic.version = 11 : i64} {
  func.func @mlp_kernel(%arg0: i32, %arg1: memref<2x128xf32, #tpu.memory_space<vmem>>, %arg2: memref<32x2xf32, #tpu.memory_space<vmem>>, %arg3: memref<32x1xf32, #tpu.memory_space<vmem>>, %arg4: memref<1x32xf32, #tpu.memory_space<vmem>>, %arg5: memref<1x1xf32, #tpu.memory_space<vmem>>, %arg6: memref<1x128xf32, #tpu.memory_space<vmem>>) attributes {dimension_semantics = [#tpu.dimension_semantics<parallel>], iteration_bounds = array<i64: 1>, scalar_prefetch = 0 : i64, scratch_operands = 0 : i64, tpu.core_type = #tpu.core_type<tc>, window_params = [{transform_indices = @transform_0, window_bounds = array<i64: 2, 128>}, {pipeline_mode = #tpu.pipeline_mode<synchronous>, transform_indices = @transform_1, window_bounds = array<i64: 32, 2>}, {pipeline_mode = #tpu.pipeline_mode<synchronous>, transform_indices = @transform_2, window_bounds = array<i64: 32, 1>}, {pipeline_mode = #tpu.pipeline_mode<synchronous>, transform_indices = @transform_3, window_bounds = array<i64: 1, 32>}, {pipeline_mode = #tpu.pipeline_mode<synchronous>, transform_indices = @transform_4, window_bounds = array<i64: 1, 1>}, {transform_indices = @transform_5, window_bounds = array<i64: 1, 128>}]} {
    %c0 = arith.constant 0 : index
    %c0_0 = arith.constant 0 : index
    %0 = vector.load %arg2[%c0, %c0_0] : memref<32x2xf32, #tpu.memory_space<vmem>>, vector<32x2xf32>
    %c0_1 = arith.constant 0 : index
    %c0_2 = arith.constant 0 : index
    %1 = vector.load %arg1[%c0_1, %c0_2] : memref<2x128xf32, #tpu.memory_space<vmem>>, vector<2x128xf32>
    %cst = arith.constant dense<0.000000e+00> : vector<32x128xf32>
    %2 = tpu.matmul %0, %1, %cst {dimension_numbers = #tpu.dot_dimension_numbers<[1], [0], [0], [1], [0, 0, 1, 1], [], []>} : vector<32x2xf32>, vector<2x128xf32>, vector<32x128xf32> -> vector<32x128xf32>
    %c0_3 = arith.constant 0 : index
    %c0_4 = arith.constant 0 : index
    %3 = vector.load %arg3[%c0_3, %c0_4] : memref<32x1xf32, #tpu.memory_space<vmem>>, vector<32x1xf32>
    %4 = vector.broadcast %3 : vector<32x1xf32> to vector<32x128xf32>
    %5 = arith.addf %2, %4 : vector<32x128xf32>
    %6 = math.tanh %5 : vector<32x128xf32>
    %c0_5 = arith.constant 0 : index
    %c0_6 = arith.constant 0 : index
    %7 = vector.load %arg4[%c0_5, %c0_6] : memref<1x32xf32, #tpu.memory_space<vmem>>, vector<1x32xf32>
    %cst_7 = arith.constant dense<0.000000e+00> : vector<1x128xf32>
    %8 = tpu.matmul %7, %6, %cst_7 {dimension_numbers = #tpu.dot_dimension_numbers<[1], [0], [0], [1], [0, 0, 1, 1], [], []>} : vector<1x32xf32>, vector<32x128xf32>, vector<1x128xf32> -> vector<1x128xf32>
    %c0_8 = arith.constant 0 : index
    %c0_9 = arith.constant 0 : index
    %9 = vector.load %arg5[%c0_8, %c0_9] : memref<1x1xf32, #tpu.memory_space<vmem>>, vector<1x1xf32>
    %10 = vector.broadcast %9 : vector<1x1xf32> to vector<1x128xf32>
    %11 = arith.addf %8, %10 : vector<1x128xf32>
    %c0_10 = arith.constant 0 : index
    %c0_11 = arith.constant 0 : index
    %12 = vector.load %arg6[%c0_10, %c0_11] : memref<1x128xf32, #tpu.memory_space<vmem>>, vector<1x128xf32>
    tpu.vector_store %arg6[%c0_10, %c0_11], %11 {strides = array<i32>} : memref<1x128xf32, #tpu.memory_space<vmem>>, vector<1x128xf32>,
    return
  }
  func.func @transform_0(%arg0: i32) -> (i32, i32) {
    %c0_i32 = arith.constant 0 : i32
    %c0_i32_0 = arith.constant 0 : i32
    return %c0_i32, %arg0 : i32, i32
  }
  func.func @transform_1(%arg0: i32) -> (i32, i32) {
    %c0_i32 = arith.constant 0 : i32
    %c0_i32_0 = arith.constant 0 : i32
    %c0_i32_1 = arith.constant 0 : i32
    return %c0_i32, %c0_i32_0 : i32, i32
  }
  func.func @transform_2(%arg0: i32) -> (i32, i32) {
    %c0_i32 = arith.constant 0 : i32
    %c0_i32_0 = arith.constant 0 : i32
    %c0_i32_1 = arith.constant 0 : i32
    return %c0_i32, %c0_i32_0 : i32, i32
  }
  func.func @transform_3(%arg0: i32) -> (i32, i32) {
    %c0_i32 = arith.constant 0 : i32
    %c0_i32_0 = arith.constant 0 : i32
    %c0_i32_1 = arith.constant 0 : i32
    return %c0_i32, %c0_i32_0 : i32, i32
  }
  func.func @transform_4(%arg0: i32) -> (i32, i32) {
    %c0_i32 = arith.constant 0 : i32
    %c0_i32_0 = arith.constant 0 : i32
    %c0_i32_1 = arith.constant 0 : i32
    return %c0_i32, %c0_i32_0 : i32, i32
  }
  func.func @transform_5(%arg0: i32) -> (i32, i32) {
    %c0_i32 = arith.constant 0 : i32
    %c0_i32_0 = arith.constant 0 : i32
    return %c0_i32, %arg0 : i32, i32
  }
}

</mosaic_0001>

<bundles_post_ra>
// kernel: module_model_forward.1
= control target key start
LH: loop header
LB: loop body
LE: loop exit
PB: predicated region body
PF: predicated region fallthrough
CT: control target
= control target key end

     0   :  { %vm64_vm0 = vcmask 1041408   ;;  %vm51_vm1 = vcmask 15360   ;;  %v302_v3 = vmov 0   ;;  %v303_v12 = vmov 0.0|0.0   ;;  %s378_s0 = inlined_call_operand.vmem [shape: f32[2,128], index: 0, kind: input, shape index: {}]   ;;  %s379_s1 = inlined_call_operand.vmem [shape: f32[32,2], index: 1, kind: input, shape index: {}]   ;;  %s380_s2 = inlined_call_operand.vmem [shape: f32[32,1], index: 2, kind: input, shape index: {}]   ;;  %s381_s4 = inlined_call_operand.<no memory space> [shape: f32[1,1], index: 4, kind: input, shape index: {}]   ;;  %s382_s3 = inlined_call_operand.vmem [shape: f32[1,32], index: 3, kind: input, shape index: {}]   ;;  %s383_s5 = inlined_call_operand.vmem [shape: f32[1,128], index: 5, kind: output, shape index: {}]  }
   0x1   :  { %v26_v0 = vld [vmem:[%s378_s0] sm:$0x3]  ;;  %v23_v2 = vld [vmem:[%s379_s1 + $0x8] sm:$0xff]  ;;  %292 = vset.pattern.permute.xlu0 %v302_v3  ;;  %293 = vset.pattern.permute.xlu1 %v302_v3  ;;  %v10_v4 = vstv %s381_s4  ;;  %v24_v5 = vld [vmem:[%s379_s1 + $0x10] sm:$0xff]  ;;  %vm304_vm2 = vmmov 0   ;;  %v305_v13 = vmov 0.0   ;;  %v164_v33 = vlaneseq }
   0x2   :  { %v22_v1 = vld [vmem:[%s379_s1] sm:$0xff]  ;;  %263 = vmatprep.subr.msk.mxu0 %vm64_vm0, %v26_v0  ;;  %11 = vst [vmem:[#allocation2] sm:$0x1] %v10_v4  ;;  %v29_v7 = vld [vmem:[%s380_s2 + $0x10] sm:$0xff]  ;;  %v28_v8 = vld [vmem:[%s380_s2 + $0x8] sm:$0xff]  ;;  %282 = vmatprep.subr.bf16.mxu1 %v303_v12  ;;  %vm168_vm3 = vcmask 261120  }
   0x3   :  { %265 = vmatprep.mubr.msk.f32.mxu0 %vm51_vm1, %v22_v1  ;;  %v27_v6 = vld [vmem:[%s380_s2] sm:$0xff]  ;;  %264 = vmatpush3.msk.msra.mxu0 %vm64_vm0, %v26_v0  ;;  %v25_v9 = vld [vmem:[%s379_s1 + $0x18] sm:$0xff]  ;;  %v165_v34 = vshrl.u32 %v164_v33, 7 }
   0x4   :  { %33 = vperm.xlu0 %292, %v27_v6   ;;  %266 = vmatmul.mubr.msk.f32.vlgmr.msra.gmra.mrb[0].mxu0 %vm51_vm1, %v23_v2  ;;  %v30_v10 = vld [vmem:[%s380_s2 + $0x18] sm:$0xff]  ;;  %v157_v32 = vld [vmem:[%s382_s3] sm:$0x1] }
   0x5   :  { %43 = vperm.xlu1 %293, %v29_v7   ;;  %268 = vmatprep.mubr.msk.f32.mxu0 %vm51_vm1, %v24_v5  ;;  %v166_v35 = vsub.s32 0, %v165_v34 }
   0x6   :  { %279 = vmatprep.mubr.msk.f32.mxu1 %vm304_vm2, %v305_v13 }
   0x8   :  { %38 = vperm.xlu0 %292, %v28_v8   ;;  %269 = vmatmul.mubr.msk.f32.gmra.mrb[2].mxu0 %vm51_vm1, %v25_v9 }
   0x9   :  { %48 = vperm.xlu1 %293, %v30_v10   ;;  %v158_v11 = vld [vmem:[#allocation2] sm:$0x1] }
   0xc   :  { %161 = vperm.xlu0 %292, %v158_v11  }
  0x83   :  { %v34_v14 = vpop.permute.xlu0 %33 }
  0x84   :  { %v44_v15 = vpop.permute.xlu1 %43 }
  0x87   :  { %v39_v16 = vpop.permute.xlu0 %38 }
  0x88   :  { %v49_v21 = vpop.permute.xlu1 %48 }
  0x8b   :  { %v162_v36 = vpop.permute.xlu0 %161 }
  0x8c   :  { %v167_v37 = vrot.slane %v162_v36, %v166_v35 }
  0xd7   :  { %v267_v17 = vpop.f32.mrb[0].mxu0 }
  0xd8   :  { %v140_v18 = vadd.f32 %v267_v17, %v39_v16  ;;  %v134_v19 = vpop.f32.mrb[1].mxu0 }
  0xd9   :  { %v135_v20 = vadd.f32 %v134_v19, %v34_v14 }
  0xda   :  { %294 = vtanh.f32 %v140_v18 }
  0xdb   :  { %296 = vtanh.f32 %v135_v20  ;;  %v270_v22 = vpop.f32.mrb[2].mxu0 }
  0xdc   :  { %v150_v23 = vadd.f32 %v270_v22, %v49_v21  ;;  %v144_v24 = vpop.f32.mrb[3].mxu0 }
  0xdd   :  { %v145_v25 = vadd.f32 %v144_v24, %v44_v15 }
  0xde   :  { %298 = vtanh.f32 %v150_v23 }
  0xdf   :  { %300 = vtanh.f32 %v145_v25 }
  0xe4   :  { %v295_v26 = vpop.eup %294 }
  0xe5   :  { %v297_v27 = vpop.eup %296 }
  0xe6   :  { %v283_v28 = vpack.c.bf16 %v295_v26, %v297_v27 }
  0xe8   :  { %v299_v29 = vpop.eup %298  ;;  %284 = vmatpush3.bf16.msra.mxu1 %v283_v28 }
  0xe9   :  { %v301_v30 = vpop.eup %300  ;;  %285 = vmatprep.subr.bf16.mxu1 %v303_v12 }
  0xea   :  { %v286_v31 = vpack.c.bf16 %v299_v29, %v301_v30 }
  0xec   :  { %287 = vmatpush3.bf16.msra.mxu1 %v286_v31 }
  0xef   :  { %280 = vmatmul.mubr.msk.f32.vlgmr.msra.gmra.mrb[0].mxu1 %vm168_vm3, %v157_v32 }
 0x1c2   :  { %v238_v38 = vpop.f32.mrb[0].mxu1 }
 0x1c3   :  { %v239_v39 = vadd.f32 %v238_v38, %v167_v37  ;;  %v281_v40 = vpop.f32.mrb[1].mxu1 }
 0x1c5   :  { %242 = vst [vmem:[%s383_s5] sm:$0x1] %v239_v39 }

</bundles_post_ra>
